<compile_context>
chip_gen: v7x
topology: tpu7x:2x2x1
jax: 0.10.0
libtpu: 0.0.40
codegen_flags: <defaults>
</compile_context>

<pallas_src>
import jax
import jax.numpy as jnp
from jax import lax
from jax.experimental import pallas as pl
from jax.experimental.pallas import tpu as pltpu


def _pad_up(x, m):
    return (x + m - 1) // m * m


def fused_conv_kernel(w_ref, x_ref, o_ref):
    """o[b, r, c] = bias + sum_{i,j<5} w[5i+j] * x[b, r+i, c+j] for a batch chunk."""
    _, Ho, Wo = o_ref.shape

    # Hoist every scalar weight into registers once (one SMEM read each).
    w = [w_ref[k] for k in range(25)]
    bias = w_ref[25]

    # Hoist the lane shift out of the 25-tap loop: 5 column-offset base tiles
    # (one lane realignment each); the inner loop below only takes row offsets.
    xj = [x_ref[:, :, j:j + Wo] for j in range(5)]          # each (B, H, Wo)

    # 4 partial accumulators break the serial vmul+vadd chain (no f32 FMA on
    # the v5e/v6e VPU); summed once at the end.
    acc = [jnp.full(o_ref.shape, bias, dtype=jnp.float32)]
    acc += [jnp.zeros(o_ref.shape, dtype=jnp.float32) for _ in range(3)]

    t = 0
    for i in range(5):
        for j in range(5):
            # Row-offset slice of a pre-shifted tile -> pure VALU MAC work.
            acc[t % 4] = acc[t % 4] + w[5 * i + j] * xj[j][:, i:i + Ho, :]
            t += 1

    o_ref[...] = (acc[0] + acc[1]) + (acc[2] + acc[3])


def fold_params(params):
    """Compose conv1(4x4) -> conv2(2x2) -> conv3(1x1) into one 5x5 + bias."""
    w1, b1, w2, b2, w3, b3 = params  # (4,4),(1,), (2,2),(1,), (1,),(1,)
    w12 = jnp.zeros((5, 5), jnp.float32)
    for p in range(2):
        for q in range(2):
            w12 = w12.at[p:p + 4, q:q + 4].add(w2[p, q] * w1)
    b12 = b1[0] * jnp.sum(w2) + b2[0]
    w_eff = w3[0] * w12                     # (5, 5)
    b_eff = w3[0] * b12 + b3[0]             # scalar
    return jnp.concatenate(
        [w_eff.reshape(-1), jnp.reshape(b_eff, (1,))]).astype(jnp.float32)  # (26,)


def _vmem_limit_bytes():
    """Per-generation scoped-VMEM budget (v7x has 64 MiB/TC, v5e/v6e 128 MiB)."""
    try:
        cap = int(pltpu.get_tpu_info().vmem_capacity_bytes)
    except Exception:
        cap = 64 * 1024 * 1024
    return int(min(max(cap // 2, 32 * 1024 * 1024), 96 * 1024 * 1024))


def _pick_batch_chunk(N, H, W, Ho, Wo, vmem_limit):
    """Largest divisor of N whose double-buffered blocks + temps fit the budget."""
    in_tile = _pad_up(H, 8) * _pad_up(W, 128) * 4
    out_tile = _pad_up(Ho, 8) * _pad_up(Wo, 128) * 4
    # 2x double-buffered in/out blocks + ~12 full-tile temporaries (5 shifted
    # base tiles, 4 accumulators, intermediates) per image -- conservative.
    per_img = 2 * in_tile + 2 * out_tile + 12 * out_tile
    budget = vmem_limit // 2
    cap = max(1, budget // per_img)
    b = min(N, cap)
    while N % b:            # keep the grid exactly divisible (no partial block)
        b -= 1
    return b


@jax.jit
def model_forward(x_nchw, params):
    """x_nchw: (N, 1, H, W) float32 -> (N, 1, H-4, W-4) float32."""
    N, C, H, W = x_nchw.shape
    assert C == 1 and H >= 5 and W >= 5
    Ho, Wo = H - 4, W - 4

    w_flat = fold_params(params)                 # (26,) scalars -> SMEM

    vmem_limit = _vmem_limit_bytes()
    B = _pick_batch_chunk(N, H, W, Ho, Wo, vmem_limit)

    x = x_nchw[:, 0]                             # (N, H, W), free squeeze

    out = pl.pallas_call(
        fused_conv_kernel,
        out_shape=jax.ShapeDtypeStruct((N, Ho, Wo), jnp.float32),
        grid=(pl.cdiv(N, B),),
        in_specs=[
            pl.BlockSpec(memory_space=pltpu.MemorySpace.SMEM),   # folded weights (26,)
            # Full H/W dims per block (full-array-dim exception to (8,128)).
            pl.BlockSpec((B, H, W), lambda n: (n, 0, 0)),
        ],
        out_specs=pl.BlockSpec((B, Ho, Wo), lambda n: (n, 0, 0)),
        compiler_params=pltpu.CompilerParams(
            dimension_semantics=("parallel",),
            vmem_limit_bytes=vmem_limit,
        ),
    )(w_flat, x)

    return out[:, None]                          # restore NCHW, free reshape


def reference_forward(x_nchw, params):
    """Plain-JAX reference using lax conv (NCHW / OIHW)."""
    w1, b1, w2, b2, w3, b3 = params
    dn = ("NCHW", "OIHW", "NCHW")

    def conv(x, w, b):
        y = lax.conv_general_dilated(x, w, (1, 1), "VALID", dimension_numbers=dn)
        return y + b.reshape(1, -1, 1, 1)

    t1 = conv(x_nchw, w1.reshape(1, 1, 4, 4), b1)
    t2 = conv(t1, w2.reshape(1, 1, 2, 2), b2)
    t7 = conv(t2, w3.reshape(1, 1, 1, 1), b3)
    return t7


def init_params(key):
    k1, k2, k3, k4, k5, k6 = jax.random.split(key, 6)
    # Conv2d(1,1,4): weight (1,1,4,4) bias (1,)   -> stored as (4,4)/(1,)
    # Conv2d(1,1,2): weight (1,1,2,2) bias (1,)   -> stored as (2,2)/(1,)
    # Conv2d(1,1,1): weight (1,1,1,1) bias (1,)   -> stored as (1,)/(1,)
    w1 = jax.random.normal(k1, (4, 4), jnp.float32) * 0.25
    b1 = jax.random.normal(k2, (1,), jnp.float32) * 0.1
    w2 = jax.random.normal(k3, (2, 2), jnp.float32) * 0.5
    b2 = jax.random.normal(k4, (1,), jnp.float32) * 0.1
    w3 = jax.random.normal(k5, (1,), jnp.float32)
    b3 = jax.random.normal(k6, (1,), jnp.float32) * 0.1
    return (w1, b1, w2, b2, w3, b3)


if __name__ == "__main__":
    root = jax.random.PRNGKey(0)
    kp, kx = jax.random.split(root)
    params = init_params(kp)

    # Small shape consistent with the module: batch=2, 1 channel, 16x16 spatial.
    x = jax.random.normal(kx, (2, 1, 16, 16), jnp.float32)

    out = jax.block_until_ready(model_forward(x, params))
    ref = jax.block_until_ready(reference_forward(x, params))

    assert out.shape == (2, 1, 12, 12), out.shape
    assert jnp.allclose(out, ref, atol=1e-4, rtol=1e-4), "mismatch vs reference conv"

    print("KERNEL_OK")
</pallas_src>

<mosaic_0001>
module attributes {stable_mosaic.version = 11 : i64} {
  func.func @fused_conv_kernel(%arg0: i32, %arg1: memref<26xf32, #tpu.memory_space<smem>>, %arg2: memref<2x16x16xf32, #tpu.memory_space<vmem>>, %arg3: memref<2x12x12xf32, #tpu.memory_space<vmem>>) attributes {dimension_semantics = [#tpu.dimension_semantics<parallel>], iteration_bounds = array<i64: 1>, scalar_prefetch = 0 : i64, scratch_operands = 0 : i64, tpu.core_type = #tpu.core_type<tc>, window_params = [{transform_indices = @transform_0, window_bounds = array<i64: 26>}, {transform_indices = @transform_1, window_bounds = array<i64: 2, 16, 16>}, {transform_indices = @transform_2, window_bounds = array<i64: 2, 12, 12>}]} {
    %c0 = arith.constant 0 : index
    %0 = memref.load %arg1[%c0] : memref<26xf32, #tpu.memory_space<smem>>
    %c1 = arith.constant 1 : index
    %1 = memref.load %arg1[%c1] : memref<26xf32, #tpu.memory_space<smem>>
    %c2 = arith.constant 2 : index
    %2 = memref.load %arg1[%c2] : memref<26xf32, #tpu.memory_space<smem>>
    %c3 = arith.constant 3 : index
    %3 = memref.load %arg1[%c3] : memref<26xf32, #tpu.memory_space<smem>>
    %c4 = arith.constant 4 : index
    %4 = memref.load %arg1[%c4] : memref<26xf32, #tpu.memory_space<smem>>
    %c5 = arith.constant 5 : index
    %5 = memref.load %arg1[%c5] : memref<26xf32, #tpu.memory_space<smem>>
    %c6 = arith.constant 6 : index
    %6 = memref.load %arg1[%c6] : memref<26xf32, #tpu.memory_space<smem>>
    %c7 = arith.constant 7 : index
    %7 = memref.load %arg1[%c7] : memref<26xf32, #tpu.memory_space<smem>>
    %c8 = arith.constant 8 : index
    %8 = memref.load %arg1[%c8] : memref<26xf32, #tpu.memory_space<smem>>
    %c9 = arith.constant 9 : index
    %9 = memref.load %arg1[%c9] : memref<26xf32, #tpu.memory_space<smem>>
    %c10 = arith.constant 10 : index
    %10 = memref.load %arg1[%c10] : memref<26xf32, #tpu.memory_space<smem>>
    %c11 = arith.constant 11 : index
    %11 = memref.load %arg1[%c11] : memref<26xf32, #tpu.memory_space<smem>>
    %c12 = arith.constant 12 : index
    %12 = memref.load %arg1[%c12] : memref<26xf32, #tpu.memory_space<smem>>
    %c13 = arith.constant 13 : index
    %13 = memref.load %arg1[%c13] : memref<26xf32, #tpu.memory_space<smem>>
    %c14 = arith.constant 14 : index
    %14 = memref.load %arg1[%c14] : memref<26xf32, #tpu.memory_space<smem>>
    %c15 = arith.constant 15 : index
    %15 = memref.load %arg1[%c15] : memref<26xf32, #tpu.memory_space<smem>>
    %c16 = arith.constant 16 : index
    %16 = memref.load %arg1[%c16] : memref<26xf32, #tpu.memory_space<smem>>
    %c17 = arith.constant 17 : index
    %17 = memref.load %arg1[%c17] : memref<26xf32, #tpu.memory_space<smem>>
    %c18 = arith.constant 18 : index
    %18 = memref.load %arg1[%c18] : memref<26xf32, #tpu.memory_space<smem>>
    %c19 = arith.constant 19 : index
    %19 = memref.load %arg1[%c19] : memref<26xf32, #tpu.memory_space<smem>>
    %c20 = arith.constant 20 : index
    %20 = memref.load %arg1[%c20] : memref<26xf32, #tpu.memory_space<smem>>
    %c21 = arith.constant 21 : index
    %21 = memref.load %arg1[%c21] : memref<26xf32, #tpu.memory_space<smem>>
    %c22 = arith.constant 22 : index
    %22 = memref.load %arg1[%c22] : memref<26xf32, #tpu.memory_space<smem>>
    %c23 = arith.constant 23 : index
    %23 = memref.load %arg1[%c23] : memref<26xf32, #tpu.memory_space<smem>>
    %c24 = arith.constant 24 : index
    %24 = memref.load %arg1[%c24] : memref<26xf32, #tpu.memory_space<smem>>
    %c25 = arith.constant 25 : index
    %25 = memref.load %arg1[%c25] : memref<26xf32, #tpu.memory_space<smem>>
    %c0_0 = arith.constant 0 : index
    %c0_1 = arith.constant 0 : index
    %c0_2 = arith.constant 0 : index
    %26 = vector.load %arg2[%c0_0, %c0_1, %c0_2] : memref<2x16x16xf32, #tpu.memory_space<vmem>>, vector<2x16x12xf32>
    %c0_3 = arith.constant 0 : index
    %c0_4 = arith.constant 0 : index
    %c1_5 = arith.constant 1 : index
    %27 = vector.load %arg2[%c0_3, %c0_4, %c1_5] : memref<2x16x16xf32, #tpu.memory_space<vmem>>, vector<2x16x12xf32>
    %c0_6 = arith.constant 0 : index
    %c0_7 = arith.constant 0 : index
    %c2_8 = arith.constant 2 : index
    %28 = vector.load %arg2[%c0_6, %c0_7, %c2_8] : memref<2x16x16xf32, #tpu.memory_space<vmem>>, vector<2x16x12xf32>
    %c0_9 = arith.constant 0 : index
    %c0_10 = arith.constant 0 : index
    %c3_11 = arith.constant 3 : index
    %29 = vector.load %arg2[%c0_9, %c0_10, %c3_11] : memref<2x16x16xf32, #tpu.memory_space<vmem>>, vector<2x16x12xf32>
    %c0_12 = arith.constant 0 : index
    %c0_13 = arith.constant 0 : index
    %c4_14 = arith.constant 4 : index
    %30 = vector.load %arg2[%c0_12, %c0_13, %c4_14] : memref<2x16x16xf32, #tpu.memory_space<vmem>>, vector<2x16x12xf32>
    %31 = vector.broadcast %25 : f32 to vector<2x12x12xf32>
    %cst = arith.constant 0.000000e+00 : f32
    %32 = vector.broadcast %cst : f32 to vector<2x12x12xf32>
    %cst_15 = arith.constant 0.000000e+00 : f32
    %33 = vector.broadcast %cst_15 : f32 to vector<2x12x12xf32>
    %cst_16 = arith.constant 0.000000e+00 : f32
    %34 = vector.broadcast %cst_16 : f32 to vector<2x12x12xf32>
    %35 = vector.extract_strided_slice %26 {offsets = [0, 0, 0], sizes = [2, 12, 12], strides = [1, 1, 1]} : vector<2x16x12xf32> to vector<2x12x12xf32>
    %36 = vector.broadcast %0 : f32 to vector<2x12x12xf32>
    %37 = arith.mulf %36, %35 : vector<2x12x12xf32>
    %38 = arith.addf %31, %37 : vector<2x12x12xf32>
    %39 = vector.extract_strided_slice %27 {offsets = [0, 0, 0], sizes = [2, 12, 12], strides = [1, 1, 1]} : vector<2x16x12xf32> to vector<2x12x12xf32>
    %40 = vector.broadcast %1 : f32 to vector<2x12x12xf32>
    %41 = arith.mulf %40, %39 : vector<2x12x12xf32>
    %42 = arith.addf %32, %41 : vector<2x12x12xf32>
    %43 = vector.extract_strided_slice %28 {offsets = [0, 0, 0], sizes = [2, 12, 12], strides = [1, 1, 1]} : vector<2x16x12xf32> to vector<2x12x12xf32>
    %44 = vector.broadcast %2 : f32 to vector<2x12x12xf32>
    %45 = arith.mulf %44, %43 : vector<2x12x12xf32>
    %46 = arith.addf %33, %45 : vector<2x12x12xf32>
    %47 = vector.extract_strided_slice %29 {offsets = [0, 0, 0], sizes = [2, 12, 12], strides = [1, 1, 1]} : vector<2x16x12xf32> to vector<2x12x12xf32>
    %48 = vector.broadcast %3 : f32 to vector<2x12x12xf32>
    %49 = arith.mulf %48, %47 : vector<2x12x12xf32>
    %50 = arith.addf %34, %49 : vector<2x12x12xf32>
    %51 = vector.extract_strided_slice %30 {offsets = [0, 0, 0], sizes = [2, 12, 12], strides = [1, 1, 1]} : vector<2x16x12xf32> to vector<2x12x12xf32>
    %52 = vector.broadcast %4 : f32 to vector<2x12x12xf32>
    %53 = arith.mulf %52, %51 : vector<2x12x12xf32>
    %54 = arith.addf %38, %53 : vector<2x12x12xf32>
    %55 = vector.extract_strided_slice %26 {offsets = [0, 1, 0], sizes = [2, 12, 12], strides = [1, 1, 1]} : vector<2x16x12xf32> to vector<2x12x12xf32>
    %56 = vector.broadcast %5 : f32 to vector<2x12x12xf32>
    %57 = arith.mulf %56, %55 : vector<2x12x12xf32>
    %58 = arith.addf %42, %57 : vector<2x12x12xf32>
    %59 = vector.extract_strided_slice %27 {offsets = [0, 1, 0], sizes = [2, 12, 12], strides = [1, 1, 1]} : vector<2x16x12xf32> to vector<2x12x12xf32>
    %60 = vector.broadcast %6 : f32 to vector<2x12x12xf32>
    %61 = arith.mulf %60, %59 : vector<2x12x12xf32>
    %62 = arith.addf %46, %61 : vector<2x12x12xf32>
    %63 = vector.extract_strided_slice %28 {offsets = [0, 1, 0], sizes = [2, 12, 12], strides = [1, 1, 1]} : vector<2x16x12xf32> to vector<2x12x12xf32>
    %64 = vector.broadcast %7 : f32 to vector<2x12x12xf32>
    %65 = arith.mulf %64, %63 : vector<2x12x12xf32>
    %66 = arith.addf %50, %65 : vector<2x12x12xf32>
    %67 = vector.extract_strided_slice %29 {offsets = [0, 1, 0], sizes = [2, 12, 12], strides = [1, 1, 1]} : vector<2x16x12xf32> to vector<2x12x12xf32>
    %68 = vector.broadcast %8 : f32 to vector<2x12x12xf32>
    %69 = arith.mulf %68, %67 : vector<2x12x12xf32>
    %70 = arith.addf %54, %69 : vector<2x12x12xf32>
    %71 = vector.extract_strided_slice %30 {offsets = [0, 1, 0], sizes = [2, 12, 12], strides = [1, 1, 1]} : vector<2x16x12xf32> to vector<2x12x12xf32>
    %72 = vector.broadcast %9 : f32 to vector<2x12x12xf32>
    %73 = arith.mulf %72, %71 : vector<2x12x12xf32>
    %74 = arith.addf %58, %73 : vector<2x12x12xf32>
    %75 = vector.extract_strided_slice %26 {offsets = [0, 2, 0], sizes = [2, 12, 12], strides = [1, 1, 1]} : vector<2x16x12xf32> to vector<2x12x12xf32>
    %76 = vector.broadcast %10 : f32 to vector<2x12x12xf32>
    %77 = arith.mulf %76, %75 : vector<2x12x12xf32>
    %78 = arith.addf %62, %77 : vector<2x12x12xf32>
    %79 = vector.extract_strided_slice %27 {offsets = [0, 2, 0], sizes = [2, 12, 12], strides = [1, 1, 1]} : vector<2x16x12xf32> to vector<2x12x12xf32>
    %80 = vector.broadcast %11 : f32 to vector<2x12x12xf32>
    %81 = arith.mulf %80, %79 : vector<2x12x12xf32>
    %82 = arith.addf %66, %81 : vector<2x12x12xf32>
    %83 = vector.extract_strided_slice %28 {offsets = [0, 2, 0], sizes = [2, 12, 12], strides = [1, 1, 1]} : vector<2x16x12xf32> to vector<2x12x12xf32>
    %84 = vector.broadcast %12 : f32 to vector<2x12x12xf32>
    %85 = arith.mulf %84, %83 : vector<2x12x12xf32>
    %86 = arith.addf %70, %85 : vector<2x12x12xf32>
    %87 = vector.extract_strided_slice %29 {offsets = [0, 2, 0], sizes = [2, 12, 12], strides = [1, 1, 1]} : vector<2x16x12xf32> to vector<2x12x12xf32>
    %88 = vector.broadcast %13 : f32 to vector<2x12x12xf32>
    %89 = arith.mulf %88, %87 : vector<2x12x12xf32>
    %90 = arith.addf %74, %89 : vector<2x12x12xf32>
    %91 = vector.extract_strided_slice %30 {offsets = [0, 2, 0], sizes = [2, 12, 12], strides = [1, 1, 1]} : vector<2x16x12xf32> to vector<2x12x12xf32>
    %92 = vector.broadcast %14 : f32 to vector<2x12x12xf32>
    %93 = arith.mulf %92, %91 : vector<2x12x12xf32>
    %94 = arith.addf %78, %93 : vector<2x12x12xf32>
    %95 = vector.extract_strided_slice %26 {offsets = [0, 3, 0], sizes = [2, 12, 12], strides = [1, 1, 1]} : vector<2x16x12xf32> to vector<2x12x12xf32>
    %96 = vector.broadcast %15 : f32 to vector<2x12x12xf32>
    %97 = arith.mulf %96, %95 : vector<2x12x12xf32>
    %98 = arith.addf %82, %97 : vector<2x12x12xf32>
    %99 = vector.extract_strided_slice %27 {offsets = [0, 3, 0], sizes = [2, 12, 12], strides = [1, 1, 1]} : vector<2x16x12xf32> to vector<2x12x12xf32>
    %100 = vector.broadcast %16 : f32 to vector<2x12x12xf32>
    %101 = arith.mulf %100, %99 : vector<2x12x12xf32>
    %102 = arith.addf %86, %101 : vector<2x12x12xf32>
    %103 = vector.extract_strided_slice %28 {offsets = [0, 3, 0], sizes = [2, 12, 12], strides = [1, 1, 1]} : vector<2x16x12xf32> to vector<2x12x12xf32>
    %104 = vector.broadcast %17 : f32 to vector<2x12x12xf32>
    %105 = arith.mulf %104, %103 : vector<2x12x12xf32>
    %106 = arith.addf %90, %105 : vector<2x12x12xf32>
    %107 = vector.extract_strided_slice %29 {offsets = [0, 3, 0], sizes = [2, 12, 12], strides = [1, 1, 1]} : vector<2x16x12xf32> to vector<2x12x12xf32>
    %108 = vector.broadcast %18 : f32 to vector<2x12x12xf32>
    %109 = arith.mulf %108, %107 : vector<2x12x12xf32>
    %110 = arith.addf %94, %109 : vector<2x12x12xf32>
    %111 = vector.extract_strided_slice %30 {offsets = [0, 3, 0], sizes = [2, 12, 12], strides = [1, 1, 1]} : vector<2x16x12xf32> to vector<2x12x12xf32>
    %112 = vector.broadcast %19 : f32 to vector<2x12x12xf32>
    %113 = arith.mulf %112, %111 : vector<2x12x12xf32>
    %114 = arith.addf %98, %113 : vector<2x12x12xf32>
    %115 = vector.extract_strided_slice %26 {offsets = [0, 4, 0], sizes = [2, 12, 12], strides = [1, 1, 1]} : vector<2x16x12xf32> to vector<2x12x12xf32>
    %116 = vector.broadcast %20 : f32 to vector<2x12x12xf32>
    %117 = arith.mulf %116, %115 : vector<2x12x12xf32>
    %118 = arith.addf %102, %117 : vector<2x12x12xf32>
    %119 = vector.extract_strided_slice %27 {offsets = [0, 4, 0], sizes = [2, 12, 12], strides = [1, 1, 1]} : vector<2x16x12xf32> to vector<2x12x12xf32>
    %120 = vector.broadcast %21 : f32 to vector<2x12x12xf32>
    %121 = arith.mulf %120, %119 : vector<2x12x12xf32>
    %122 = arith.addf %106, %121 : vector<2x12x12xf32>
    %123 = vector.extract_strided_slice %28 {offsets = [0, 4, 0], sizes = [2, 12, 12], strides = [1, 1, 1]} : vector<2x16x12xf32> to vector<2x12x12xf32>
    %124 = vector.broadcast %22 : f32 to vector<2x12x12xf32>
    %125 = arith.mulf %124, %123 : vector<2x12x12xf32>
    %126 = arith.addf %110, %125 : vector<2x12x12xf32>
    %127 = vector.extract_strided_slice %29 {offsets = [0, 4, 0], sizes = [2, 12, 12], strides = [1, 1, 1]} : vector<2x16x12xf32> to vector<2x12x12xf32>
    %128 = vector.broadcast %23 : f32 to vector<2x12x12xf32>
    %129 = arith.mulf %128, %127 : vector<2x12x12xf32>
    %130 = arith.addf %114, %129 : vector<2x12x12xf32>
    %131 = vector.extract_strided_slice %30 {offsets = [0, 4, 0], sizes = [2, 12, 12], strides = [1, 1, 1]} : vector<2x16x12xf32> to vector<2x12x12xf32>
    %132 = vector.broadcast %24 : f32 to vector<2x12x12xf32>
    %133 = arith.mulf %132, %131 : vector<2x12x12xf32>
    %134 = arith.addf %118, %133 : vector<2x12x12xf32>
    %135 = arith.addf %134, %122 : vector<2x12x12xf32>
    %136 = arith.addf %126, %130 : vector<2x12x12xf32>
    %137 = arith.addf %135, %136 : vector<2x12x12xf32>
    %c0_17 = arith.constant 0 : index
    %c0_18 = arith.constant 0 : index
    %c0_19 = arith.constant 0 : index
    %138 = vector.load %arg3[%c0_17, %c0_18, %c0_19] : memref<2x12x12xf32, #tpu.memory_space<vmem>>, vector<2x12x12xf32>
    tpu.vector_store %arg3[%c0_17, %c0_18, %c0_19], %137 {strides = array<i32>} : memref<2x12x12xf32, #tpu.memory_space<vmem>>, vector<2x12x12xf32>,
    return
  }
  func.func @transform_0(%arg0: i32) -> i32 {
    %c0_i32 = arith.constant 0 : i32
    %c0_i32_0 = arith.constant 0 : i32
    return %c0_i32 : i32
  }
  func.func @transform_1(%arg0: i32) -> (i32, i32, i32) {
    %c0_i32 = arith.constant 0 : i32
    %c0_i32_0 = arith.constant 0 : i32
    %c0_i32_1 = arith.constant 0 : i32
    return %arg0, %c0_i32, %c0_i32_0 : i32, i32, i32
  }
  func.func @transform_2(%arg0: i32) -> (i32, i32, i32) {
    %c0_i32 = arith.constant 0 : i32
    %c0_i32_0 = arith.constant 0 : i32
    %c0_i32_1 = arith.constant 0 : i32
    return %arg0, %c0_i32, %c0_i32_0 : i32, i32, i32
  }
}

</mosaic_0001>

<bundles_post_ra>
// kernel: model_forward.1
= control target key start
LH: loop header
LB: loop body
LE: loop exit
PB: predicated region body
PF: predicated region fallthrough
CT: control target
= control target key end

     0   :  { %7 = vsyncpa [#allocation3], 0  ;;  %s1124_s0 = inlined_call_operand.vmem [shape: f32[26], index: 0, kind: input, shape index: {}]   ;;  %s1125_s1 = inlined_call_operand.vmem [shape: f32[2,16,16], index: 1, kind: input, shape index: {}]   ;;  %s1126_s2 = inlined_call_operand.vmem [shape: f32[2,12,12], index: 2, kind: output, shape index: {}]  }
   0x1   :  { %s14_s11 = sshll.u32 %s1124_s0, 4  ;;  %s15_s11 = int_to_ptr.vmem [resolvable:$true] %s14_s11 }
   0x2   :  { %s812_s12 = scalar_lea.vmem %s15_s11, 16  ;;  %p817_p1 = scmp.lt.s32.totalorder %s15_s11, %s15_s11 }
   0x3   :  { %p813_p0 = scmp.ne.s32.totalorder %s15_s11, %s812_s12  ;;  %p818_p2 = scmp.lt.s32.totalorder %s812_s12, %s812_s12 }
   0x5   :  { %p819_p3 = por %p818_p2, %p817_p1 }
   0x7   :  { %p820_p4 = pnand %p819_p3, %p813_p0 }
   0x9   :  { %823 = shalt.err (!%p820_p4)
}
   0xa   :  { %s826_s13 = smov [#allocation2]  }
   0xb   :  { %17 = dma.vmem_to_smem %s15_s11, 16, %s826_s13, [#allocation3]  }
   0xc   :  { %824 = dma.done.wait [#allocation3], 16  }
   0xd   :  { %825 = vsyncadd [#allocation3], 4294967280 }
   0xe   :  { %23 = sfence }
   0xf   :  { %s785_s14 = sld [smem:[#allocation2 + $0x7]]  ;;  %s789_s15 = sld [smem:[#allocation2 + $0xb]]  ;;  %v855_v0 = vld [vmem:[%s1125_s1 + $0x18] sm:$0xff]  ;;  %v860_v1 = vld [vmem:[%s1125_s1 + $0x8] sm:$0xff]  ;;  %v865_v2 = vld [vmem:[%s1125_s1] sm:$0xff]  ;;  %vm125_vm0 = vcmask 1046528  }
  0x10   :  { %s793_s21 = sld [smem:[#allocation2 + $0xf]]  ;;  %v875_v10 = vld [vmem:[%s1125_s1 + $0x10] sm:$0xff]  ;;  %s827_s24 = smov 1   ;;  %vm281_vm1 = vcmask 1045504   ;;  %vm437_vm2 = vcmask 1044480   ;;  %vm593_vm3 = vcmask 1043456  }
  0x11   :  { %s797_s25 = sld [smem:[#allocation2 + $0x13]]  ;;  %s828_s1 = smov 2   ;;  %vm770_vm4 = vcmask 93184   ;;  %vm768_vm5 = vcmask 97280  }
  0x12   :  { %s783_s26 = sld [smem:[#allocation2 + $0x5]]  ;;  %s829_s27 = smov 3  }
  0x13   :  { %s784_s28 = sld [smem:[#allocation2 + $0x6]]  ;;  %s830_s29 = smov 127  }
  0x14   :  { %s787_s30 = sld [smem:[#allocation2 + $0x9]]  ;;  %s788_s3 = sld [smem:[#allocation2 + $0xa]] }
  0x15   :  { %v179_v3 = vstv %s785_s14  ;;  %v304_v6 = vstv %s789_s15  ;;  %s791_s4 = sld [smem:[#allocation2 + $0xd]]  ;;  %s831_s5 = smov 125  }
  0x16   :  { %v183_v4 = vmul.f32 %v179_v3, %v855_v0  ;;  %v181_v5 = vmul.f32 %v179_v3, %v860_v1  ;;  %v180_v7 = vmul.f32 %v179_v3, %v865_v2  ;;  %v306_v8 = vmul.f32 %v304_v6, %v860_v1  ;;  %s792_s6 = sld [smem:[#allocation2 + $0xe]]  ;;  %s795_s7 = sld [smem:[#allocation2 + $0x11]] }
  0x17   :  { %v305_v9 = vmul.f32 %v304_v6, %v865_v2  ;;  %v308_v15 = vmul.f32 %v304_v6, %v855_v0  ;;  %v182_v16 = vmul.f32 %v179_v3, %v875_v10  ;;  %v307_v17 = vmul.f32 %v304_v6, %v875_v10  ;;  %s832_s8 = smov 126   ;;  %s796_s9 = sld [smem:[#allocation2 + $0x12]] }
  0x18   :  { %v192_v11 = vrot.slane %v183_v4, 1  ;;  %v189_v12 = vrot.slane %v181_v5, 1  ;;  %v188_v13 = vrot.slane %v180_v7, 1  ;;  %v314_v14 = vrot.slane %v306_v8, 2  ;;  %s781_s10 = sld [smem:[#allocation2 + $0x3]]  ;;  %s801_s11 = sld [smem:[#allocation2 + $0x17]] }
  0x19   :  { %v313_v19 = vrot.slane %v305_v9, 2  ;;  %v428_v20 = vstv %s793_s21  ;;  %v317_v21 = vrot.slane %v308_v15, 2  ;;  %v191_v22 = vrot.slane %v182_v16, 1  ;;  %s782_s12 = sld [smem:[#allocation2 + $0x4]]  ;;  %s786_s13 = sld [smem:[#allocation2 + $0x8]] }
  0x1a   :  { %200 = vrot.lane.b32.xlu1 %v192_v11, %s827_s24  ;;  %196 = vrot.lane.b32.xlu0 %v189_v12, %s827_s24  ;;  %v190_v18 = vsel %vm125_vm0, %v188_v13, %v189_v12  ;;  %v316_v23 = vrot.slane %v307_v17, 2  ;;  %v430_v25 = vmul.f32 %v428_v20, %v860_v1  ;;  %v429_v26 = vmul.f32 %v428_v20, %v865_v2  ;;  %s790_s14 = sld [smem:[#allocation2 + $0xc]]  ;;  %s833_s15 = smov 124  }
  0x1b   :  { %v315_v24 = vsel %vm281_vm1, %v313_v19, %v314_v14  ;;  %v193_v27 = vsel %vm125_vm0, %v191_v22, %v192_v11  ;;  %v553_v29 = vstv %s797_s25  ;;  %v432_v32 = vmul.f32 %v428_v20, %v855_v0  ;;  %s780_s16 = sld [smem:[#allocation2 + $0x2]]  ;;  %s794_s17 = sld [smem:[#allocation2 + $0x10]] }
  0x1c   :  { %v318_v28 = vsel %vm281_vm1, %v316_v23, %v317_v21  ;;  %v439_v30 = vrot.slane %v430_v25, 3  ;;  %v438_v31 = vrot.slane %v429_v26, 3  ;;  %v431_v33 = vmul.f32 %v428_v20, %v875_v10  ;;  %s802_s0 = sld [smem:[#allocation2 + $0x18]]  ;;  %s779_s18 = sld [smem:[#allocation2 + $0x1]] }
  0x1d   :  { %v555_v34 = vmul.f32 %v553_v29, %v860_v1  ;;  %v442_v36 = vrot.slane %v432_v32, 3  ;;  %v554_v38 = vmul.f32 %v553_v29, %v865_v2  ;;  %v557_v39 = vmul.f32 %v553_v29, %v855_v0  ;;  %s799_s19 = sld [smem:[#allocation2 + $0x15]]  ;;  %s800_s20 = sld [smem:[#allocation2 + $0x16]] }
  0x1e   :  { %321 = vrot.lane.b32.xlu1 %v314_v14, %s828_s1  ;;  %194 = vrot.lane.b32.xlu0 %v190_v18, %s827_s24  ;;  %v440_v35 = vsel %vm437_vm2, %v438_v31, %v439_v30  ;;  %v441_v37 = vrot.slane %v431_v33, 3  ;;  %v556_v43 = vmul.f32 %v553_v29, %v875_v10  ;;  %v116_v44 = vstv %s783_s26  ;;  %s24_s21 = sld [smem:[#allocation2]]  ;;  %s803_s22 = sld [smem:[#allocation2 + $0x19]] }
  0x1f   :  { %v563_v41 = vrot.slane %v555_v34, 3  ;;  %v562_v42 = vrot.slane %v554_v38, 3  ;;  %v566_v45 = vrot.slane %v557_v39, 3  ;;  %v118_v48 = vmul.f32 %v116_v44, %v860_v1  ;;  %s798_s23 = sld [smem:[#allocation2 + $0x14]] }
  0x20   :  { %v443_v40 = vsel %vm437_vm2, %v441_v37, %v442_v36  ;;  %v565_v47 = vrot.slane %v556_v43, 3  ;;  %v117_v49 = vmul.f32 %v116_v44, %v865_v2  ;;  %v120_v50 = vmul.f32 %v116_v44, %v855_v0 }
  0x21   :  { %v564_v46 = vsel %vm437_vm2, %v562_v42, %v563_v41  ;;  %v119_v51 = vmul.f32 %v116_v44, %v875_v10  ;;  %v127_v53 = vrot.slane %v118_v48, 1  ;;  %v148_v55 = vstv %s784_s28 }
  0x22   :  { %325 = vrot.lane.b32.xlu1 %v317_v21, %s828_s1  ;;  %319 = vrot.lane.b32.xlu0 %v315_v24, %s828_s1  ;;  %v567_v52 = vsel %vm437_vm2, %v565_v47, %v566_v45  ;;  %v126_v54 = vrot.slane %v117_v49, 1  ;;  %v150_v56 = vmul.f32 %v148_v55, %v860_v1  ;;  %v130_v58 = vrot.slane %v120_v50, 1 }
  0x23   :  { %v129_v59 = vrot.slane %v119_v51, 1  ;;  %v149_v60 = vmul.f32 %v148_v55, %v865_v2  ;;  %v152_v61 = vmul.f32 %v148_v55, %v855_v0  ;;  %v151_v4 = vmul.f32 %v148_v55, %v875_v10 }
  0x24   :  { %v128_v57 = vsel %vm125_vm0, %v126_v54, %v127_v53  ;;  %v158_v63 = vrot.slane %v150_v56, 1  ;;  %v241_v5 = vstv %s787_s30  ;;  %v272_v17 = vstv %s788_s3 }
  0x25   :  { %v131_v62 = vsel %vm125_vm0, %v129_v59, %v130_v58  ;;  %v157_v3 = vrot.slane %v149_v60, 1  ;;  %v161_v6 = vrot.slane %v152_v61, 1  ;;  %v160_v8 = vrot.slane %v151_v4, 1 }
  0x26   :  { %198 = vrot.lane.b32.xlu1 %v193_v27, %s827_s24  ;;  %323 = vrot.lane.b32.xlu0 %v318_v28, %s828_s1  ;;  %v243_v9 = vmul.f32 %v241_v5, %v860_v1  ;;  %v242_v11 = vmul.f32 %v241_v5, %v865_v2  ;;  %v245_v12 = vmul.f32 %v241_v5, %v855_v0  ;;  %v366_v24 = vstv %s791_s4 }
  0x27   :  { %v159_v7 = vsel %vm125_vm0, %v157_v3, %v158_v63  ;;  %v162_v13 = vsel %vm125_vm0, %v160_v8, %v161_v6  ;;  %v244_v16 = vmul.f32 %v241_v5, %v875_v10  ;;  %v274_v21 = vmul.f32 %v272_v17, %v860_v1 }
  0x28   :  { %v251_v14 = vrot.slane %v243_v9, 1  ;;  %v250_v15 = vrot.slane %v242_v11, 1  ;;  %v254_v18 = vrot.slane %v245_v12, 1  ;;  %v273_v22 = vmul.f32 %v272_v17, %v865_v2 }
  0x29   :  { %v253_v20 = vrot.slane %v244_v16, 1  ;;  %v276_v23 = vmul.f32 %v272_v17, %v855_v0  ;;  %v283_v26 = vrot.slane %v274_v21, 2  ;;  %v275_v28 = vmul.f32 %v272_v17, %v875_v10 }
  0x2a   :  { %446 = vrot.lane.b32.xlu1 %v439_v30, %s829_s27  ;;  %444 = vrot.lane.b32.xlu0 %v440_v35, %s829_s27  ;;  %v252_v19 = vsel %vm125_vm0, %v250_v15, %v251_v14  ;;  %v282_v27 = vrot.slane %v273_v22, 2  ;;  %v368_v29 = vmul.f32 %v366_v24, %v860_v1  ;;  %v367_v33 = vmul.f32 %v366_v24, %v865_v2 }
  0x2b   :  { %v255_v25 = vsel %vm125_vm0, %v253_v20, %v254_v18  ;;  %v286_v31 = vrot.slane %v276_v23, 2  ;;  %v285_v32 = vrot.slane %v275_v28, 2  ;;  %v397_v35 = vstv %s792_s6 }
  0x2c   :  { %v284_v30 = vsel %vm281_vm1, %v282_v27, %v283_v26  ;;  %v376_v34 = vrot.slane %v368_v29, 2  ;;  %v375_v37 = vrot.slane %v367_v33, 2  ;;  %v370_v38 = vmul.f32 %v366_v24, %v855_v0 }
  0x2d   :  { %v369_v39 = vmul.f32 %v366_v24, %v875_v10  ;;  %v398_v44 = vmul.f32 %v397_v35, %v865_v2  ;;  %v400_v49 = vmul.f32 %v397_v35, %v875_v10  ;;  %v491_v50 = vstv %s795_s7 }
  0x2e   :  { %450 = vrot.lane.b32.xlu1 %v442_v36, %s829_s27  ;;  %448 = vrot.lane.b32.xlu0 %v443_v40, %s829_s27  ;;  %v287_v36 = vsel %vm281_vm1, %v285_v32, %v286_v31  ;;  %v399_v40 = vmul.f32 %v397_v35, %v860_v1  ;;  %v379_v42 = vrot.slane %v370_v38, 2  ;;  %v493_v54 = vmul.f32 %v491_v50, %v860_v1 }
  0x2f   :  { %v378_v43 = vrot.slane %v369_v39, 2  ;;  %v406_v48 = vrot.slane %v398_v44, 2  ;;  %v492_v55 = vmul.f32 %v491_v50, %v865_v2  ;;  %v495_v56 = vmul.f32 %v491_v50, %v855_v0 }
  0x30   :  { %v407_v47 = vrot.slane %v399_v40, 2  ;;  %v494_v60 = vmul.f32 %v491_v50, %v875_v10  ;;  %v522_v61 = vstv %s796_s9  ;;  %v82_v22 = vstv %s781_s10 }
  0x31   :  { %v500_v59 = vrot.slane %v492_v55, 3  ;;  %v524_v4 = vmul.f32 %v522_v61, %v860_v1  ;;  %v523_v5 = vmul.f32 %v522_v61, %v865_v2  ;;  %v525_v11 = vmul.f32 %v522_v61, %v875_v10 }
  0x32   :  { %570 = vrot.lane.b32.xlu1 %v563_v41, %s830_s29  ;;  %568 = vrot.lane.b32.xlu0 %v564_v46, %s830_s29  ;;  %v377_v41 = vsel %vm281_vm1, %v375_v37, %v376_v34  ;;  %v380_v46 = vsel %vm281_vm1, %v378_v43, %v379_v42  ;;  %v503_v3 = vrot.slane %v494_v60, 3  ;;  %v83_v27 = vmul.f32 %v82_v22, %v865_v2 }
  0x33   :  { %v532_v8 = vrot.slane %v524_v4, 3  ;;  %v531_v9 = vrot.slane %v523_v5, 3  ;;  %v85_v32 = vmul.f32 %v82_v22, %v875_v10  ;;  %v86_v33 = vmul.f32 %v82_v22, %v855_v0 }
  0x34   :  { %v91_v5 = vstv %s782_s12 }
  0x35   :  { %v533_v12 = vsel %vm437_vm2, %v531_v9, %v532_v8 }
  0x36   :  { %574 = vrot.lane.b32.xlu1 %v566_v45, %s830_s29  ;;  %572 = vrot.lane.b32.xlu0 %v567_v52, %s830_s29  ;;  %v401_v45 = vmul.f32 %v397_v35, %v855_v0  ;;  %v408_v52 = vsel %vm281_vm1, %v406_v48, %v407_v47 }
  0x38   :  { %v410_v51 = vrot.slane %v401_v45, 2 }
  0x3a   :  { %134 = vrot.lane.b32.xlu1 %v127_v53, %s827_s24  ;;  %132 = vrot.lane.b32.xlu0 %v128_v57, %s827_s24  ;;  %v409_v53 = vrot.slane %v400_v49, 2 }
  0x3c   :  { %v411_v57 = vsel %vm281_vm1, %v409_v53, %v410_v51 }
  0x3e   :  { %138 = vrot.lane.b32.xlu1 %v130_v58, %s827_s24  ;;  %136 = vrot.lane.b32.xlu0 %v131_v62, %s827_s24  ;;  %v501_v58 = vrot.slane %v493_v54, 3  ;;  %v504_v62 = vrot.slane %v495_v56, 3 }
  0x42   :  { %165 = vrot.lane.b32.xlu1 %v158_v63, %s827_s24  ;;  %163 = vrot.lane.b32.xlu0 %v159_v7, %s827_s24  ;;  %v502_v63 = vsel %vm437_vm2, %v500_v59, %v501_v58  ;;  %v505_v7 = vsel %vm437_vm2, %v503_v3, %v504_v62 }
  0x46   :  { %169 = vrot.lane.b32.xlu1 %v161_v6, %s827_s24  ;;  %167 = vrot.lane.b32.xlu0 %v162_v13, %s827_s24  ;;  %v526_v6 = vmul.f32 %v522_v61, %v855_v0 }
  0x48   :  { %v535_v13 = vrot.slane %v526_v6, 3  ;;  %v210_v6 = vstv %s786_s13 }
  0x4a   :  { %258 = vrot.lane.b32.xlu1 %v251_v14, %s831_s5  ;;  %256 = vrot.lane.b32.xlu0 %v252_v19, %s831_s5  ;;  %v534_v14 = vrot.slane %v525_v11, 3 }
  0x4c   :  { %v536_v15 = vsel %vm437_vm2, %v534_v14, %v535_v13  ;;  %v212_v14 = vmul.f32 %v210_v6, %v860_v1 }
  0x4e   :  { %262 = vrot.lane.b32.xlu1 %v254_v18, %s831_s5  ;;  %260 = vrot.lane.b32.xlu0 %v255_v25, %s831_s5  ;;  %v654_v25 = vstv %s801_s11 }
  0x4f   :  { %v658_v40 = vmul.f32 %v654_v25, %v855_v0 }
  0x52   :  { %290 = vrot.lane.b32.xlu1 %v283_v26, %s828_s1  ;;  %288 = vrot.lane.b32.xlu0 %v284_v30, %s828_s1  ;;  %v84_v26 = vmul.f32 %v82_v22, %v860_v1  ;;  %v656_v30 = vmul.f32 %v654_v25, %v860_v1  ;;  %v214_v22 = vmul.f32 %v210_v6, %v855_v0 }
  0x54   :  { %v664_v38 = vrot.slane %v656_v30, 4  ;;  %v223_v30 = vrot.slane %v214_v22, 1 }
  0x56   :  { %294 = vrot.lane.b32.xlu1 %v286_v31, %s828_s1  ;;  %292 = vrot.lane.b32.xlu0 %v287_v36, %s828_s1  ;;  %v655_v31 = vmul.f32 %v654_v25, %v865_v2 }
  0x58   :  { %v663_v39 = vrot.slane %v655_v31, 4 }
  0x5a   :  { %383 = vrot.lane.b32.xlu1 %v376_v34, %s832_s8  ;;  %381 = vrot.lane.b32.xlu0 %v377_v41, %s832_s8  ;;  %v657_v41 = vmul.f32 %v654_v25, %v875_v10  ;;  %v665_v49 = vsel %vm593_vm3, %v663_v39, %v664_v38 }
  0x5e   :  { %387 = vrot.lane.b32.xlu1 %v379_v42, %s832_s8  ;;  %385 = vrot.lane.b32.xlu0 %v380_v46, %s832_s8 }
  0x62   :  { %414 = vrot.lane.b32.xlu1 %v407_v47, %s832_s8  ;;  %412 = vrot.lane.b32.xlu0 %v408_v52, %s832_s8  ;;  %v666_v52 = vrot.slane %v657_v41, 4 }
  0x66   :  { %418 = vrot.lane.b32.xlu1 %v410_v51, %s832_s8  ;;  %416 = vrot.lane.b32.xlu0 %v411_v57, %s832_s8  ;;  %v667_v51 = vrot.slane %v658_v40, 4  ;;  %v460_v40 = vstv %s794_s17 }
  0x6a   :  { %508 = vrot.lane.b32.xlu1 %v501_v58, %s830_s29  ;;  %506 = vrot.lane.b32.xlu0 %v502_v63, %s830_s29 }
  0x6e   :  { %512 = vrot.lane.b32.xlu1 %v504_v62, %s830_s29  ;;  %510 = vrot.lane.b32.xlu0 %v505_v7, %s830_s29  ;;  %v668_v62 = vsel %vm593_vm3, %v666_v52, %v667_v51 }
  0x72   :  { %539 = vrot.lane.b32.xlu1 %v532_v8, %s830_s29  ;;  %537 = vrot.lane.b32.xlu0 %v533_v12, %s830_s29  ;;  %v93_v12 = vmul.f32 %v91_v5, %v860_v1 }
  0x76   :  { %543 = vrot.lane.b32.xlu1 %v535_v13, %s830_s29  ;;  %541 = vrot.lane.b32.xlu0 %v536_v15, %s830_s29  ;;  %v92_v13 = vmul.f32 %v91_v5, %v865_v2  ;;  %v211_v15 = vmul.f32 %v210_v6, %v865_v2 }
  0x8c   :  { %v201_v16 = vpop.permute.xlu1 %200  ;;  %v197_v17 = vpop.permute.xlu0 %196 }
  0x8d   :  { %v207_v34 = vadd.f32 %v197_v17, %v84_v26  ;;  %v209_v45 = vadd.f32 %v201_v16, %v86_v33 }
  0x90   :  { %v322_v18 = vpop.permute.xlu1 %321  ;;  %v195_v19 = vpop.permute.xlu0 %194 }
  0x91   :  { %v206_v35 = vadd.f32 %v195_v19, %v83_v27  ;;  %v332_v42 = vadd.f32 %v322_v18, %v207_v34  ;;  %v95_v18 = vmul.f32 %v91_v5, %v855_v0  ;;  %v94_v19 = vmul.f32 %v91_v5, %v875_v10 }
  0x94   :  { %v326_v20 = vpop.permute.xlu1 %325  ;;  %v320_v21 = vpop.permute.xlu0 %319 }
  0x95   :  { %v331_v43 = vadd.f32 %v320_v21, %v206_v35  ;;  %v334_v53 = vadd.f32 %v326_v20, %v209_v45  ;;  %v220_v20 = vrot.slane %v212_v14, 1  ;;  %v219_v21 = vrot.slane %v211_v15, 1 }
  0x98   :  { %v199_v23 = vpop.permute.xlu1 %198  ;;  %v324_v24 = vpop.permute.xlu0 %323 }
  0x99   :  { %v208_v44 = vadd.f32 %v199_v23, %v85_v32  ;;  %v213_v23 = vmul.f32 %v210_v6, %v875_v10 }
  0x9b   :  { %v333_v54 = vadd.f32 %v324_v24, %v208_v44  ;;  %v335_v24 = vstv %s790_s14  ;;  %v222_v31 = vrot.slane %v213_v23, 1 }
  0x9c   :  { %v447_v28 = vpop.permute.xlu1 %446  ;;  %v445_v29 = vpop.permute.xlu0 %444  ;;  %v337_v27 = vmul.f32 %v335_v24, %v860_v1  ;;  %v338_v39 = vmul.f32 %v335_v24, %v875_v10 }
  0x9d   :  { %v457_v46 = vadd.f32 %v447_v28, %v332_v42  ;;  %v456_v47 = vadd.f32 %v445_v29, %v331_v43  ;;  %v336_v28 = vmul.f32 %v335_v24, %v865_v2  ;;  %v221_v29 = vsel %vm125_vm0, %v219_v21, %v220_v20 }
  0x9e   :  { %v345_v34 = vrot.slane %v337_v27, 2 }
  0x9f   :  { %v344_v35 = vrot.slane %v336_v28, 2 }
  0xa0   :  { %v451_v36 = vpop.permute.xlu1 %450  ;;  %v449_v37 = vpop.permute.xlu0 %448 }
  0xa1   :  { %v459_v57 = vadd.f32 %v451_v36, %v334_v53  ;;  %v458_v58 = vadd.f32 %v449_v37, %v333_v54  ;;  %v73_v36 = vstv %s780_s16  ;;  %v224_v37 = vsel %vm125_vm0, %v222_v31, %v223_v30 }
  0xa2   :  { %v75_v43 = vmul.f32 %v73_v36, %v860_v1  ;;  %v74_v44 = vmul.f32 %v73_v36, %v865_v2  ;;  %v346_v45 = vsel %vm281_vm1, %v344_v35, %v345_v34  ;;  %v464_v54 = vmul.f32 %v460_v40, %v855_v0 }
  0xa4   :  { %v571_v48 = vpop.permute.xlu1 %570  ;;  %v569_v50 = vpop.permute.xlu0 %568 }
  0xa5   :  { %v581_v55 = vadd.f32 %v571_v48, %v457_v46  ;;  %v580_v56 = vadd.f32 %v569_v50, %v456_v47  ;;  %v347_v47 = vrot.slane %v338_v39, 2  ;;  %v462_v48 = vmul.f32 %v460_v40, %v860_v1 }
  0xa6   :  { %v77_v50 = vmul.f32 %v73_v36, %v855_v0  ;;  %v608_v39 = vstv %s799_s19 }
  0xa7   :  { %v674_v59 = vadd.f32 %v664_v38, %v581_v55  ;;  %v673_v60 = vadd.f32 %v665_v49, %v580_v56  ;;  %v339_v38 = vmul.f32 %v335_v24, %v855_v0  ;;  %v461_v49 = vmul.f32 %v460_v40, %v865_v2 }
  0xa8   :  { %v575_v61 = vpop.permute.xlu1 %574  ;;  %v573_v63 = vpop.permute.xlu0 %572 }
  0xa9   :  { %v583_v3 = vadd.f32 %v575_v61, %v459_v57  ;;  %v582_v4 = vadd.f32 %v573_v63, %v458_v58  ;;  %734 = vrot.lane.b32.xlu1 %v674_v59, %s830_s29  ;;  %732 = vrot.lane.b32.xlu0 %v673_v60, %s830_s29  ;;  %v348_v46 = vrot.slane %v339_v38, 2  ;;  %v463_v57 = vmul.f32 %v460_v40, %v875_v10 }
  0xaa   :  { %v470_v59 = vrot.slane %v462_v48, 3  ;;  %v469_v60 = vrot.slane %v461_v49, 3  ;;  %v677_v61 = vstv %s802_s0  ;;  %v609_v49 = vmul.f32 %v608_v39, %v865_v2 }
  0xab   :  { %v676_v7 = vadd.f32 %v667_v51, %v583_v3  ;;  %v675_v8 = vadd.f32 %v668_v62, %v582_v4  ;;  %v76_v51 = vmul.f32 %v73_v36, %v875_v10  ;;  %v349_v58 = vsel %vm281_vm1, %v347_v47, %v348_v46 }
  0xac   :  { %v1000_v9 = vpop.permute.xlu1 %134  ;;  %v1002_v11 = vpop.permute.xlu0 %132  ;;  %v473_v4 = vrot.slane %v464_v54, 3  ;;  %v678_v14 = vmul.f32 %v677_v61, %v865_v2 }
  0xad   :  { %738 = vrot.lane.b32.xlu1 %v676_v7, %s830_s29  ;;  %736 = vrot.lane.b32.xlu0 %v675_v8, %s830_s29  ;;  %v472_v8 = vrot.slane %v463_v57, 3  ;;  %v617_v57 = vrot.slane %v609_v49, 4 }
  0xae   :  { %v686_v24 = vrot.slane %v678_v14, 4 }
  0xaf   :  { %v474_v22 = vsel %vm437_vm2, %v472_v8, %v473_v4 }
  0xb0   :  { %v1010_v16 = vpop.permute.xlu1 %138  ;;  %v1012_v17 = vpop.permute.xlu0 %136 }
  0xb1   :  { %102 = vrot.lane.b32.xlu1 %v93_v12, %s833_s15  ;;  %100 = vrot.lane.b32.xlu0 %v92_v13, %s833_s15  ;;  %v471_v12 = vsel %vm437_vm2, %v469_v60, %v470_v59  ;;  %v679_v13 = vmul.f32 %v677_v61, %v860_v1 }
  0xb3   :  { %v687_v23 = vrot.slane %v679_v13, 4 }
  0xb4   :  { %v166_v25 = vpop.permute.xlu1 %165  ;;  %v164_v26 = vpop.permute.xlu0 %163 }
  0xb5   :  { %106 = vrot.lane.b32.xlu1 %v95_v18, %s833_s15  ;;  %104 = vrot.lane.b32.xlu0 %v94_v19, %s833_s15  ;;  %v176_v55 = vadd.f32 %v166_v25, %v75_v43  ;;  %v175_v56 = vadd.f32 %v164_v26, %v74_v44  ;;  %v64_v19 = vstv %s779_s18  ;;  %v681_v25 = vmul.f32 %v677_v61, %v855_v0 }
  0xb6   :  { %v680_v26 = vmul.f32 %v677_v61, %v875_v10  ;;  %v66_v27 = vmul.f32 %v64_v19, %v860_v1  ;;  %v688_v31 = vsel %vm593_vm3, %v686_v24, %v687_v23  ;;  %v68_v35 = vmul.f32 %v64_v19, %v855_v0 }
  0xb7   :  { %v67_v36 = vmul.f32 %v64_v19, %v875_v10  ;;  %v610_v44 = vmul.f32 %v608_v39, %v860_v1 }
  0xb8   :  { %v170_v32 = vpop.permute.xlu1 %169  ;;  %v168_v33 = vpop.permute.xlu0 %167 }
  0xb9   :  { %227 = vrot.lane.b32.xlu1 %v220_v20, %s831_s5  ;;  %225 = vrot.lane.b32.xlu0 %v221_v29, %s831_s5  ;;  %v178_v62 = vadd.f32 %v170_v32, %v77_v50  ;;  %v177_v5 = vadd.f32 %v168_v33, %v76_v51  ;;  %v690_v32 = vrot.slane %v681_v25, 4  ;;  %v689_v33 = vrot.slane %v680_v26, 4 }
  0xba   :  { %v618_v54 = vrot.slane %v610_v44, 4 }
  0xbb   :  { %v691_v43 = vsel %vm593_vm3, %v689_v33, %v690_v32 }
  0xbc   :  { %v1030_v41 = vpop.permute.xlu1 %258  ;;  %v1032_v42 = vpop.permute.xlu0 %256 }
  0xbd   :  { %231 = vrot.lane.b32.xlu1 %v223_v30, %s831_s5  ;;  %229 = vrot.lane.b32.xlu0 %v224_v37, %s831_s5  ;;  %v65_v30 = vmul.f32 %v64_v19, %v865_v2 }
  0xbf   :  { %v144_v40 = vadd.f32 %v1002_v11, %v65_v30 }
  0xc0   :  { %v1043_v52 = vpop.permute.xlu1 %262  ;;  %v1045_v53 = vpop.permute.xlu0 %260 }
  0xc1   :  { %352 = vrot.lane.b32.xlu1 %v345_v34, %s832_s8  ;;  %350 = vrot.lane.b32.xlu0 %v346_v45, %s832_s8  ;;  %v145_v34 = vadd.f32 %v1000_v9, %v66_v27  ;;  %v147_v45 = vadd.f32 %v1010_v16, %v68_v35  ;;  %v146_v9 = vadd.f32 %v1012_v17, %v67_v36 }
  0xc2   :  { %v268_v11 = vadd.f32 %v1032_v42, %v144_v40 }
  0xc3   :  { %v271_v16 = vadd.f32 %v1043_v52, %v147_v45  ;;  %v270_v17 = vadd.f32 %v1045_v53, %v146_v9 }
  0xc4   :  { %v291_v63 = vpop.permute.xlu1 %290  ;;  %v289_v3 = vpop.permute.xlu0 %288 }
  0xc5   :  { %v301_v6 = vadd.f32 %v291_v63, %v176_v55  ;;  %v300_v7 = vadd.f32 %v289_v3, %v175_v56  ;;  %356 = vrot.lane.b32.xlu1 %v348_v46, %s832_s8  ;;  %354 = vrot.lane.b32.xlu0 %v349_v58, %s832_s8  ;;  %v269_v46 = vadd.f32 %v1030_v41, %v145_v34 }
  0xc6   :  { %v612_v55 = vmul.f32 %v608_v39, %v855_v0  ;;  %v611_v58 = vmul.f32 %v608_v39, %v875_v10  ;;  %v619_v63 = vsel %vm593_vm3, %v617_v57, %v618_v54 }
  0xc8   :  { %v295_v15 = vpop.permute.xlu1 %294  ;;  %v293_v18 = vpop.permute.xlu0 %292 }
  0xc9   :  { %v303_v20 = vadd.f32 %v295_v15, %v178_v62  ;;  %v302_v21 = vadd.f32 %v293_v18, %v177_v5  ;;  %477 = vrot.lane.b32.xlu1 %v470_v59, %s830_s29  ;;  %475 = vrot.lane.b32.xlu0 %v471_v12, %s830_s29  ;;  %v620_v5 = vrot.slane %v611_v58, 4 }
  0xcc   :  { %v384_v28 = vpop.permute.xlu1 %383  ;;  %v382_v29 = vpop.permute.xlu0 %381 }
  0xcd   :  { %481 = vrot.lane.b32.xlu1 %v473_v4, %s830_s29  ;;  %479 = vrot.lane.b32.xlu0 %v474_v22, %s830_s29  ;;  %v394_v59 = vadd.f32 %v384_v28, %v269_v46  ;;  %v393_v42 = vadd.f32 %v382_v29, %v268_v11  ;;  %v621_v4 = vrot.slane %v612_v55, 4  ;;  %v631_v22 = vstv %s800_s20 }
  0xce   :  { %v632_v24 = vmul.f32 %v631_v22, %v865_v2  ;;  %v635_v29 = vmul.f32 %v631_v22, %v855_v0  ;;  %v634_v30 = vmul.f32 %v631_v22, %v875_v10 }
  0xcf   :  { %v622_v14 = vsel %vm593_vm3, %v620_v5, %v621_v4 }
  0xd0   :  { %v388_v37 = vpop.permute.xlu1 %387  ;;  %v386_v38 = vpop.permute.xlu0 %385  ;;  %v640_v28 = vrot.slane %v632_v24, 4  ;;  %v644_v36 = vrot.slane %v635_v29, 4 }
  0xd1   :  { %694 = vrot.lane.b32.xlu1 %v687_v23, %s833_s15  ;;  %692 = vrot.lane.b32.xlu0 %v688_v31, %s833_s15  ;;  %v633_v23 = vmul.f32 %v631_v22, %v860_v1 }
  0xd3   :  { %v641_v27 = vrot.slane %v633_v23, 4 }
  0xd4   :  { %v415_v47 = vpop.permute.xlu1 %414  ;;  %v413_v48 = vpop.permute.xlu0 %412 }
  0xd5   :  { %v425_v50 = vadd.f32 %v415_v47, %v301_v6  ;;  %v424_v51 = vadd.f32 %v413_v48, %v300_v7  ;;  %698 = vrot.lane.b32.xlu1 %v690_v32, %s833_s15  ;;  %696 = vrot.lane.b32.xlu0 %v691_v43, %s833_s15  ;;  %v396_v6 = vadd.f32 %v388_v37, %v271_v16  ;;  %v643_v37 = vrot.slane %v634_v30, 4 }
  0xd6   :  { %v395_v7 = vadd.f32 %v386_v38, %v270_v17  ;;  %v642_v35 = vsel %vm593_vm3, %v640_v28, %v641_v27 }
  0xd7   :  { %v645_v9 = vsel %vm593_vm3, %v643_v37, %v644_v36 }
  0xd8   :  { %v419_v41 = vpop.permute.xlu1 %418  ;;  %v417_v56 = vpop.permute.xlu0 %416 }
  0xd9   :  { %v427_v60 = vadd.f32 %v419_v41, %v303_v20  ;;  %v426_v61 = vadd.f32 %v417_v56, %v302_v21 }
  0xdc   :  { %v509_v62 = vpop.permute.xlu1 %508  ;;  %v507_v3 = vpop.permute.xlu0 %506 }
  0xdd   :  { %v519_v52 = vadd.f32 %v509_v62, %v394_v59  ;;  %v518_v8 = vadd.f32 %v507_v3, %v393_v42 }
  0xdf   :  { %v628_v53 = vadd.f32 %v618_v54, %v519_v52  ;;  %v627_v12 = vadd.f32 %v619_v63, %v518_v8  ;;  %v55_v63 = vstv %s24_s21 }
  0xe0   :  { %v513_v13 = vpop.permute.xlu1 %512  ;;  %v511_v15 = vpop.permute.xlu0 %510  ;;  %v57_v5 = vmul.f32 %v55_v63, %v860_v1 }
  0xe1   :  { %v521_v18 = vadd.f32 %v513_v13, %v396_v6  ;;  %v520_v19 = vadd.f32 %v511_v15, %v395_v7  ;;  %714 = vrot.lane.b32.xlu1 %v628_v53, %s830_s29  ;;  %712 = vrot.lane.b32.xlu0 %v627_v12, %s830_s29  ;;  %v56_v6 = vmul.f32 %v55_v63, %v865_v2  ;;  %v54_v7 = vstv %s803_s22 }
  0xe2   :  { %v61_v52 = vadd.f32 %v57_v5, %v54_v7  ;;  %v59_v53 = vmul.f32 %v55_v63, %v855_v0  ;;  %v58_v12 = vmul.f32 %v55_v63, %v875_v10 }
  0xe3   :  { %v630_v20 = vadd.f32 %v621_v4, %v521_v18  ;;  %v629_v21 = vadd.f32 %v622_v14, %v520_v19  ;;  %v60_v8 = vadd.f32 %v56_v6, %v54_v7 }
  0xe4   :  { %v540_v25 = vpop.permute.xlu1 %539  ;;  %v538_v26 = vpop.permute.xlu0 %537  ;;  %v63_v19 = vadd.f32 %v59_v53, %v54_v7 }
  0xe5   :  { %718 = vrot.lane.b32.xlu1 %v630_v20, %s830_s29  ;;  %716 = vrot.lane.b32.xlu0 %v629_v21, %s830_s29  ;;  %v550_v31 = vadd.f32 %v540_v25, %v425_v50  ;;  %v549_v32 = vadd.f32 %v538_v26, %v424_v51  ;;  %v62_v20 = vadd.f32 %v58_v12, %v54_v7  ;;  %v584_v21 = vstv %s798_s23 }
  0xe6   :  { %v586_v28 = vmul.f32 %v584_v21, %v860_v1  ;;  %v585_v29 = vmul.f32 %v584_v21, %v865_v2 }
  0xe7   :  { %v651_v40 = vadd.f32 %v641_v27, %v550_v31  ;;  %v650_v43 = vadd.f32 %v642_v35, %v549_v32 }
  0xe8   :  { %v544_v33 = vpop.permute.xlu1 %543  ;;  %v542_v34 = vpop.permute.xlu0 %541  ;;  %v594_v35 = vrot.slane %v585_v29, 4 }
  0xe9   :  { %v552_v38 = vadd.f32 %v544_v33, %v427_v60  ;;  %v551_v39 = vadd.f32 %v542_v34, %v426_v61  ;;  %v595_v34 = vrot.slane %v586_v28, 4 }
  0xeb   :  { %v653_v48 = vadd.f32 %v644_v36, %v552_v38  ;;  %v652_v49 = vadd.f32 %v645_v9, %v551_v39  ;;  %v588_v36 = vmul.f32 %v584_v21, %v855_v0  ;;  %v587_v38 = vmul.f32 %v584_v21, %v875_v10 }
  0xec   :  { %v596_v1 = vsel %vm593_vm3, %v594_v35, %v595_v34 }
  0xed   :  { %v598_v9 = vrot.slane %v588_v36, 4  ;;  %v597_v2 = vrot.slane %v587_v38, 4 }
  0xef   :  { %v599_v0 = vsel %vm593_vm3, %v597_v2, %v598_v9 }
 0x11b   :  { %v735_v44 = vpop.permute.xlu1 %734  ;;  %v733_v45 = vpop.permute.xlu0 %732 }
 0x11c   :  { %v745_v46 = vadd.f32 %v735_v44, %v651_v40  ;;  %v744_v47 = vadd.f32 %v733_v45, %v650_v43 }
 0x11e   :  { %754 = vrot.lane.b32.xlu1 %v745_v46, %s832_s8  ;;  %752 = vrot.lane.b32.xlu0 %v744_v47, %s832_s8 }
 0x11f   :  { %v739_v11 = vpop.permute.xlu1 %738  ;;  %v737_v50 = vpop.permute.xlu0 %736 }
 0x120   :  { %v747_v51 = vadd.f32 %v739_v11, %v653_v48  ;;  %v746_v54 = vadd.f32 %v737_v50, %v652_v49 }
 0x122   :  { %758 = vrot.lane.b32.xlu1 %v747_v51, %s832_s8  ;;  %756 = vrot.lane.b32.xlu0 %v746_v54, %s832_s8 }
 0x123   :  { %v103_v55 = vpop.permute.xlu1 %102  ;;  %v101_v16 = vpop.permute.xlu0 %100 }
 0x124   :  { %v113_v15 = vadd.f32 %v103_v55, %v61_v52  ;;  %v112_v18 = vadd.f32 %v101_v16, %v60_v8 }
 0x127   :  { %v107_v17 = vpop.permute.xlu1 %106  ;;  %v105_v41 = vpop.permute.xlu0 %104 }
 0x128   :  { %v115_v24 = vadd.f32 %v107_v17, %v63_v19  ;;  %v114_v25 = vadd.f32 %v105_v41, %v62_v20 }
 0x12b   :  { %v228_v56 = vpop.permute.xlu1 %227  ;;  %v226_v57 = vpop.permute.xlu0 %225 }
 0x12c   :  { %v238_v26 = vadd.f32 %v228_v56, %v113_v15  ;;  %v237_v27 = vadd.f32 %v226_v57, %v112_v18 }
 0x12f   :  { %v232_v58 = vpop.permute.xlu1 %231  ;;  %v230_v59 = vpop.permute.xlu0 %229 }
 0x130   :  { %v240_v30 = vadd.f32 %v232_v58, %v115_v24  ;;  %v239_v31 = vadd.f32 %v230_v59, %v114_v25 }
 0x133   :  { %v353_v42 = vpop.permute.xlu1 %352  ;;  %v351_v60 = vpop.permute.xlu0 %350 }
 0x134   :  { %v363_v32 = vadd.f32 %v353_v42, %v238_v26  ;;  %v362_v33 = vadd.f32 %v351_v60, %v237_v27 }
 0x137   :  { %v357_v61 = vpop.permute.xlu1 %356  ;;  %v355_v62 = vpop.permute.xlu0 %354 }
 0x138   :  { %v365_v40 = vadd.f32 %v357_v61, %v240_v30  ;;  %v364_v43 = vadd.f32 %v355_v62, %v239_v31 }
 0x13b   :  { %v478_v3 = vpop.permute.xlu1 %477  ;;  %v476_v4 = vpop.permute.xlu0 %475 }
 0x13c   :  { %v488_v44 = vadd.f32 %v478_v3, %v363_v32  ;;  %v487_v45 = vadd.f32 %v476_v4, %v362_v33 }
 0x13e   :  { %v605_v11 = vadd.f32 %v595_v34, %v488_v44  ;;  %v604_v50 = vadd.f32 %v596_v1, %v487_v45 }
 0x13f   :  { %v482_v13 = vpop.permute.xlu1 %481  ;;  %v480_v14 = vpop.permute.xlu0 %479 }
 0x140   :  { %v490_v48 = vadd.f32 %v482_v13, %v365_v40  ;;  %v489_v49 = vadd.f32 %v480_v14, %v364_v43 }
 0x142   :  { %v607_v10 = vadd.f32 %v598_v9, %v490_v48  ;;  %v606_v55 = vadd.f32 %v599_v0, %v489_v49 }
 0x143   :  { %v695_v22 = vpop.permute.xlu1 %694  ;;  %v693_v23 = vpop.permute.xlu0 %692 }
 0x144   :  { %v705_v51 = vadd.f32 %v695_v22, %v605_v11  ;;  %v704_v54 = vadd.f32 %v693_v23, %v604_v50 }
 0x147   :  { %v699_v37 = vpop.permute.xlu1 %698  ;;  %v697_v39 = vpop.permute.xlu0 %696 }
 0x148   :  { %v707_v41 = vadd.f32 %v699_v37, %v607_v10  ;;  %v706_v56 = vadd.f32 %v697_v39, %v606_v55 }
 0x153   :  { %v715_v46 = vpop.permute.xlu1 %714  ;;  %v713_v47 = vpop.permute.xlu0 %712 }
 0x154   :  { %v725_v57 = vadd.f32 %v715_v46, %v705_v51  ;;  %v724_v58 = vadd.f32 %v713_v47, %v704_v54 }
 0x157   :  { %v719_v16 = vpop.permute.xlu1 %718  ;;  %v717_v17 = vpop.permute.xlu0 %716 }
 0x158   :  { %v727_v62 = vadd.f32 %v719_v16, %v707_v41  ;;  %v726_v63 = vadd.f32 %v717_v17, %v706_v56 }
 0x190   :  { %v755_v59 = vpop.permute.xlu1 %754  ;;  %v753_v42 = vpop.permute.xlu0 %752 }
 0x191   :  { %v765_v60 = vadd.f32 %v755_v59, %v725_v57  ;;  %v764_v61 = vadd.f32 %v753_v42, %v724_v58 }
 0x193   :  { %771 = vst.msk [vmem:[%s1126_s2 + $0x8] sm:$0xf] %vm770_vm4, %v765_v60 }
 0x194   :  { %769 = vst.msk [vmem:[%s1126_s2] sm:$0xff] %vm768_vm5, %v764_v61  ;;  %v759_v3 = vpop.permute.xlu1 %758  ;;  %v757_v4 = vpop.permute.xlu0 %756 }
 0x195   :  { %v767_v5 = vadd.f32 %v759_v3, %v727_v62  ;;  %v766_v6 = vadd.f32 %v757_v4, %v726_v63 }
 0x197   :  { %773 = vst.msk [vmem:[%s1126_s2 + $0x18] sm:$0xf] %vm770_vm4, %v767_v5 }
 0x198   :  { %772 = vst.msk [vmem:[%s1126_s2 + $0x10] sm:$0xff] %vm768_vm5, %v766_v6 }
 0x199   :  { %778 = vsyncpa [#allocation3], 1 }

</bundles_post_ra>
